<compile_context>
chip_gen: v5e
topology: v5e:2x2
jax: 0.10.0
libtpu: 0.0.40
codegen_flags: <defaults>
</compile_context>

<pallas_src>
import functools

import numpy as np
import jax
import jax.numpy as jnp
from jax.experimental import pallas as pl
from jax.experimental.pallas import tpu as pltpu


_TAPS = (0.25, 0.5, 0.25)  # [1, 2, 1] / 4 -- separable factor of the 3-D filter.


def _round_up(x, m):
    return ((x + m - 1) // m) * m


def _cdiv(a, b):
    return (a + b - 1) // b


# -----------------------------------------------------------------------------
# Host-side constant operators (replicate padding folded into the boundaries).
# -----------------------------------------------------------------------------

@functools.lru_cache(maxsize=None)
def _band_matrix(out_size: int, in_size: int):
    """1-D stride-2 downsample matrix (out_size, in_size); replicate padding is
    folded into the boundary rows (e.g. first row = [0.75, 0.25, 0, ...])."""
    m = np.zeros((out_size, in_size), np.float32)
    for o in range(out_size):
        for k, wt in enumerate(_TAPS):
            i = min(max(2 * o + k - 1, 0), in_size - 1)
            m[o, i] += wt
    return m


@functools.lru_cache(maxsize=None)
def _hw_kron_operator(h: int, w: int, ho: int, wo: int):
    """(H*W, Ho*Wo) operator = (Mh (x) Mw)^T so that  z_flat @ M  applies the H
    and W downsamples in one MXU matmul (row i_h*W+i_w, column o_h*Wo+o_w)."""
    mh = _band_matrix(ho, h)  # (Ho, H)
    mw = _band_matrix(wo, w)  # (Wo, W)
    return np.kron(mh.T, mw.T).astype(np.float32)  # (H*W, Ho*Wo)


@functools.lru_cache(maxsize=None)
def _depth_taps(d: int, d_out: int):
    """Static per-output-depth (input_plane, weight) taps; replicate padding is
    folded into boundary weights (e.g. first slice -> ((0, 0.75), (1, 0.25)))."""
    taps = []
    for o in range(d_out):
        acc = {}
        for k, wt in enumerate(_TAPS):
            i = min(max(2 * o + k - 1, 0), d - 1)
            acc[i] = acc.get(i, 0.0) + wt
        taps.append(tuple(sorted(acc.items())))
    return tuple(taps)


# -----------------------------------------------------------------------------
# Kernel.
# -----------------------------------------------------------------------------

def _make_kernel(d: int, howo: int, d_taps):
    def kernel(m_ref, x_ref, o_ref):
        # m_ref: (H*W, Ho*Wo) constant operator   (hoisted, DMA'd once)
        # x_ref: (B, D, H*W) unpadded input block
        # o_ref: (B, Do*Ho*Wo) flattened output block (one wide DMA per step)
        m = m_ref[...]

        # One MXU matmul per input depth plane: M = B channel rows,
        # N = Ho*Wo lanes, f32 accumulation.  Reading planes straight from the
        # ref avoids a full-block value copy and any relayout reshape.
        planes = [
            jnp.dot(x_ref[:, p, :], m, preferred_element_type=jnp.float32)
            for p in range(d)
        ]

        # 3-tap depth combine (VPU, f32) on the already HW-reduced data; each
        # output-depth slice lands at its static lane offset of the flat block.
        for o, taps in enumerate(d_taps):
            y = None
            for plane, wt in taps:
                term = wt * planes[plane]
                y = term if y is None else y + term
            o_ref[:, o * howo:(o + 1) * howo] = y.astype(o_ref.dtype)

    return kernel


# -----------------------------------------------------------------------------
# VMEM sizing / channel batching.
# -----------------------------------------------------------------------------

def _vmem_capacity_bytes() -> int:
    try:
        return int(pltpu.get_tpu_info().vmem_capacity_bytes)
    except Exception:
        pass
    try:
        kind = jax.devices()[0].device_kind.lower()
    except Exception:
        kind = ""
    if "7x" in kind or "v7" in kind:
        return 64 * 1024 * 1024
    if "v2" in kind or "v3" in kind:
        return 16 * 1024 * 1024
    if kind:
        return 128 * 1024 * 1024   # v4 / v5e / v5p / v6e class
    return 64 * 1024 * 1024        # unknown: conservative (v7x-sized)


def _per_channel_vmem_bytes(d, hw, do, howo, in_isz, cdt_isz):
    out_flat = do * howo
    est = (2 * d * hw * in_isz        # input block, double-buffered
           + 2 * out_flat * in_isz    # output block, double-buffered
           + 3 * hw * cdt_isz         # transient input-plane values
           + d * howo * 4             # f32 matmul results (all planes live)
           + 2 * howo * 4             # depth-combine temporaries
           + howo * in_isz)           # dtype-cast copy before store
    return int(est * 1.25) + 1024     # slack


def _pick_channel_batch(nc: int, cap_b: int) -> int:
    """Channels per grid step.  Keeps the output-block (8,128) rule (B multiple
    of 8 or B == nc), uses cdiv grids (no divisor constraint) and prefers an
    even number of grid steps so both v7x TensorCores get equal work."""
    cap_b = max(1, int(cap_b))
    if nc <= cap_b:
        if nc <= 8:
            return nc
        b = _round_up(_cdiv(nc, 2), 8)        # split for megacore even if it fits
        return nc if b >= nc else b
    b = max(8, (cap_b // 8) * 8) if cap_b >= 8 else min(nc, 8)
    g = _cdiv(nc, b)
    if g > 1 and g % 2 == 1:                  # prefer an even grid
        b2 = _round_up(_cdiv(nc, g + 1), 8)
        if 0 < b2 <= b:
            b = b2
    return min(b, nc)


# -----------------------------------------------------------------------------
# Wrapper.
# -----------------------------------------------------------------------------

def anti_alias_downsample(x, *, channel_batch=None):
    """x: (N, C, D, H, W) -> (N, C, ceil(D/2), ceil(H/2), ceil(W/2)).

    Equivalent to F.conv3d(F.pad(x, (1,)*6, 'replicate'), binomial_filter,
                           stride=2, padding=0, groups=C)."""
    n, c, d, h, w = x.shape
    do = (d - 1) // 2 + 1
    ho = (h - 1) // 2 + 1
    wo = (w - 1) // 2 + 1
    nc, hw, howo = n * c, h * w, ho * wo
    out_flat = do * howo

    in_isz = x.dtype.itemsize
    is_bf16 = x.dtype == jnp.bfloat16
    op_dtype = jnp.bfloat16 if is_bf16 else jnp.float32  # filter weights are exact in bf16
    op_isz = 2 if is_bf16 else 4

    vmem_cap = _vmem_capacity_bytes()
    vmem_limit = min(100 * 1024 * 1024, (vmem_cap * 3) // 4)  # 96 MiB (v5e/v6e), 48 MiB (v7x)
    block_budget = vmem_cap // 2                              # 64 MiB (v5e/v6e), 32 MiB (v7x)

    op_bytes = hw * howo * op_isz
    per_ch = _per_channel_vmem_bytes(d, hw, do, howo, in_isz, op_isz)
    fixed = 2 * op_bytes + (1 << 20)
    cap_b = (block_budget - fixed) // per_ch

    if 2 * op_bytes > block_budget // 2 or cap_b < 1:
        # Spatial extent too large for the fused (H*W, Ho*Wo) operator in VMEM.
        # TODO(synk): separable two-stage Pallas path for very large H*W.
        return _reference(x)

    if channel_batch is not None:
        b = min(nc, int(channel_batch))
        if b < nc and b % 8 != 0:
            b = min(nc, _round_up(b, 8))      # keep the output block 8-aligned
    else:
        b = _pick_channel_batch(nc, cap_b)
    g = _cdiv(nc, b)

    m_hw = jnp.asarray(_hw_kron_operator(h, w, ho, wo), dtype=op_dtype)
    x_flat = x.reshape(nc, d, hw)             # merges contiguous minor dims only

    out = pl.pallas_call(
        _make_kernel(d, howo, _depth_taps(d, do)),
        out_shape=jax.ShapeDtypeStruct((nc, out_flat), x.dtype),
        grid=(g,),
        in_specs=[
            pl.BlockSpec((hw, howo), lambda i: (0, 0)),     # constant operator (hoisted)
            pl.BlockSpec((b, d, hw), lambda i: (i, 0, 0)),  # channel batch
        ],
        out_specs=pl.BlockSpec((b, out_flat), lambda i: (i, 0)),  # flat, lane-dense
        compiler_params=pltpu.CompilerParams(
            dimension_semantics=("parallel",),
            vmem_limit_bytes=int(vmem_limit),
        ),
    )(m_hw, x_flat)
    return out.reshape(n, c, do, ho, wo)


# -----------------------------------------------------------------------------
# Pure-JAX reference (also used as the large-spatial fallback).
# -----------------------------------------------------------------------------

def _reference(x):
    """conv3d(replicate_pad(x), binomial_filter, stride=2, groups=C) in plain JAX."""
    n, c, d, h, w = x.shape
    do = (d - 1) // 2 + 1
    ho = (h - 1) // 2 + 1
    wo = (w - 1) // 2 + 1
    xp = jnp.pad(x.astype(jnp.float32),
                 ((0, 0), (0, 0), (1, 1), (1, 1), (1, 1)), mode="edge")
    a = np.array([1.0, 2.0, 1.0], np.float32)
    filt = a[:, None, None] * a[None, :, None] * a[None, None, :]
    filt = filt / filt.sum()
    out = jnp.zeros((n, c, do, ho, wo), jnp.float32)
    for kd in range(3):
        for kh in range(3):
            for kw in range(3):
                out = out + float(filt[kd, kh, kw]) * xp[
                    :, :,
                    kd: kd + 2 * do: 2,
                    kh: kh + 2 * ho: 2,
                    kw: kw + 2 * wo: 2,
                ]
    return out.astype(x.dtype)


if __name__ == "__main__":
    key = jax.random.PRNGKey(0)
    k1, k2 = jax.random.split(key)

    # Case 1: canonical small shape (N, C, D, H, W).  Values are kept
    # bf16-representable so the MXU result matches the pure-f32 reference to
    # ~1e-6 regardless of the default matmul precision.
    x1 = jax.random.normal(k1, (2, 4, 8, 16, 16), jnp.float32)
    x1 = x1.astype(jnp.bfloat16).astype(jnp.float32)
    out1 = jax.block_until_ready(anti_alias_downsample(x1))
    assert out1.shape == (2, 4, 4, 8, 8), out1.shape
    np.testing.assert_allclose(np.asarray(out1), np.asarray(_reference(x1)),
                               atol=1e-5, rtol=1e-5)

    # Case 2: odd spatial dims + ragged channel grid (exercises the clamped
    # boundary taps, cdiv grid with masked boundary write-back, odd depth).
    x2 = jax.random.normal(k2, (3, 5, 5, 9, 11), jnp.float32)
    x2 = x2.astype(jnp.bfloat16).astype(jnp.float32)
    out2 = jax.block_until_ready(anti_alias_downsample(x2, channel_batch=8))
    assert out2.shape == (3, 5, 3, 5, 6), out2.shape
    np.testing.assert_allclose(np.asarray(out2), np.asarray(_reference(x2)),
                               atol=1e-5, rtol=1e-5)

    print("KERNEL_OK")
</pallas_src>

<mosaic_0001>
module attributes {stable_mosaic.version = 11 : i64} {
  func.func @kernel(%arg0: i32, %arg1: memref<256x64xf32, #tpu.memory_space<vmem>>, %arg2: memref<8x8x256xf32, #tpu.memory_space<vmem>>, %arg3: memref<8x256xf32, #tpu.memory_space<vmem>>) attributes {dimension_semantics = [#tpu.dimension_semantics<parallel>], iteration_bounds = array<i64: 1>, scalar_prefetch = 0 : i64, scratch_operands = 0 : i64, tpu.core_type = #tpu.core_type<tc>, window_params = [{pipeline_mode = #tpu.pipeline_mode<synchronous>, transform_indices = @transform_0, window_bounds = array<i64: 256, 64>}, {transform_indices = @transform_1, window_bounds = array<i64: 8, 8, 256>}, {transform_indices = @transform_2, window_bounds = array<i64: 8, 256>}]} {
    %c0 = arith.constant 0 : index
    %c0_0 = arith.constant 0 : index
    %0 = vector.load %arg1[%c0, %c0_0] : memref<256x64xf32, #tpu.memory_space<vmem>>, vector<256x64xf32>
    %c0_1 = arith.constant 0 : index
    %c0_2 = arith.constant 0 : index
    %c0_3 = arith.constant 0 : index
    %1 = vector.load %arg2[%c0_1, %c0_2, %c0_3] : memref<8x8x256xf32, #tpu.memory_space<vmem>>, vector<8x1x256xf32>
    %2 = vector.shape_cast %1 : vector<8x1x256xf32> to vector<8x256xf32>
    %cst = arith.constant dense<0.000000e+00> : vector<8x64xf32>
    %3 = tpu.matmul %2, %0, %cst {dimension_numbers = #tpu.dot_dimension_numbers<[1], [0], [0], [1], [0, 0, 1, 1], [], []>} : vector<8x256xf32>, vector<256x64xf32>, vector<8x64xf32> -> vector<8x64xf32>
    %c0_4 = arith.constant 0 : index
    %c1 = arith.constant 1 : index
    %c0_5 = arith.constant 0 : index
    %4 = vector.load %arg2[%c0_4, %c1, %c0_5] : memref<8x8x256xf32, #tpu.memory_space<vmem>>, vector<8x1x256xf32>
    %5 = vector.shape_cast %4 : vector<8x1x256xf32> to vector<8x256xf32>
    %cst_6 = arith.constant dense<0.000000e+00> : vector<8x64xf32>
    %6 = tpu.matmul %5, %0, %cst_6 {dimension_numbers = #tpu.dot_dimension_numbers<[1], [0], [0], [1], [0, 0, 1, 1], [], []>} : vector<8x256xf32>, vector<256x64xf32>, vector<8x64xf32> -> vector<8x64xf32>
    %c0_7 = arith.constant 0 : index
    %c2 = arith.constant 2 : index
    %c0_8 = arith.constant 0 : index
    %7 = vector.load %arg2[%c0_7, %c2, %c0_8] : memref<8x8x256xf32, #tpu.memory_space<vmem>>, vector<8x1x256xf32>
    %8 = vector.shape_cast %7 : vector<8x1x256xf32> to vector<8x256xf32>
    %cst_9 = arith.constant dense<0.000000e+00> : vector<8x64xf32>
    %9 = tpu.matmul %8, %0, %cst_9 {dimension_numbers = #tpu.dot_dimension_numbers<[1], [0], [0], [1], [0, 0, 1, 1], [], []>} : vector<8x256xf32>, vector<256x64xf32>, vector<8x64xf32> -> vector<8x64xf32>
    %c0_10 = arith.constant 0 : index
    %c3 = arith.constant 3 : index
    %c0_11 = arith.constant 0 : index
    %10 = vector.load %arg2[%c0_10, %c3, %c0_11] : memref<8x8x256xf32, #tpu.memory_space<vmem>>, vector<8x1x256xf32>
    %11 = vector.shape_cast %10 : vector<8x1x256xf32> to vector<8x256xf32>
    %cst_12 = arith.constant dense<0.000000e+00> : vector<8x64xf32>
    %12 = tpu.matmul %11, %0, %cst_12 {dimension_numbers = #tpu.dot_dimension_numbers<[1], [0], [0], [1], [0, 0, 1, 1], [], []>} : vector<8x256xf32>, vector<256x64xf32>, vector<8x64xf32> -> vector<8x64xf32>
    %c0_13 = arith.constant 0 : index
    %c4 = arith.constant 4 : index
    %c0_14 = arith.constant 0 : index
    %13 = vector.load %arg2[%c0_13, %c4, %c0_14] : memref<8x8x256xf32, #tpu.memory_space<vmem>>, vector<8x1x256xf32>
    %14 = vector.shape_cast %13 : vector<8x1x256xf32> to vector<8x256xf32>
    %cst_15 = arith.constant dense<0.000000e+00> : vector<8x64xf32>
    %15 = tpu.matmul %14, %0, %cst_15 {dimension_numbers = #tpu.dot_dimension_numbers<[1], [0], [0], [1], [0, 0, 1, 1], [], []>} : vector<8x256xf32>, vector<256x64xf32>, vector<8x64xf32> -> vector<8x64xf32>
    %c0_16 = arith.constant 0 : index
    %c5 = arith.constant 5 : index
    %c0_17 = arith.constant 0 : index
    %16 = vector.load %arg2[%c0_16, %c5, %c0_17] : memref<8x8x256xf32, #tpu.memory_space<vmem>>, vector<8x1x256xf32>
    %17 = vector.shape_cast %16 : vector<8x1x256xf32> to vector<8x256xf32>
    %cst_18 = arith.constant dense<0.000000e+00> : vector<8x64xf32>
    %18 = tpu.matmul %17, %0, %cst_18 {dimension_numbers = #tpu.dot_dimension_numbers<[1], [0], [0], [1], [0, 0, 1, 1], [], []>} : vector<8x256xf32>, vector<256x64xf32>, vector<8x64xf32> -> vector<8x64xf32>
    %c0_19 = arith.constant 0 : index
    %c6 = arith.constant 6 : index
    %c0_20 = arith.constant 0 : index
    %19 = vector.load %arg2[%c0_19, %c6, %c0_20] : memref<8x8x256xf32, #tpu.memory_space<vmem>>, vector<8x1x256xf32>
    %20 = vector.shape_cast %19 : vector<8x1x256xf32> to vector<8x256xf32>
    %cst_21 = arith.constant dense<0.000000e+00> : vector<8x64xf32>
    %21 = tpu.matmul %20, %0, %cst_21 {dimension_numbers = #tpu.dot_dimension_numbers<[1], [0], [0], [1], [0, 0, 1, 1], [], []>} : vector<8x256xf32>, vector<256x64xf32>, vector<8x64xf32> -> vector<8x64xf32>
    %c0_22 = arith.constant 0 : index
    %c7 = arith.constant 7 : index
    %c0_23 = arith.constant 0 : index
    %22 = vector.load %arg2[%c0_22, %c7, %c0_23] : memref<8x8x256xf32, #tpu.memory_space<vmem>>, vector<8x1x256xf32>
    %23 = vector.shape_cast %22 : vector<8x1x256xf32> to vector<8x256xf32>
    %cst_24 = arith.constant dense<0.000000e+00> : vector<8x64xf32>
    %24 = tpu.matmul %23, %0, %cst_24 {dimension_numbers = #tpu.dot_dimension_numbers<[1], [0], [0], [1], [0, 0, 1, 1], [], []>} : vector<8x256xf32>, vector<256x64xf32>, vector<8x64xf32> -> vector<8x64xf32>
    %cst_25 = arith.constant 7.500000e-01 : f32
    %25 = vector.broadcast %cst_25 : f32 to vector<8x64xf32>
    %26 = arith.mulf %25, %3 : vector<8x64xf32>
    %cst_26 = arith.constant 2.500000e-01 : f32
    %27 = vector.broadcast %cst_26 : f32 to vector<8x64xf32>
    %28 = arith.mulf %27, %6 : vector<8x64xf32>
    %29 = arith.addf %26, %28 : vector<8x64xf32>
    %c0_27 = arith.constant 0 : index
    %c0_28 = arith.constant 0 : index
    %30 = vector.load %arg3[%c0_27, %c0_28] : memref<8x256xf32, #tpu.memory_space<vmem>>, vector<8x64xf32>
    tpu.vector_store %arg3[%c0_27, %c0_28], %29 {strides = array<i32>} : memref<8x256xf32, #tpu.memory_space<vmem>>, vector<8x64xf32>,
    %cst_29 = arith.constant 2.500000e-01 : f32
    %31 = vector.broadcast %cst_29 : f32 to vector<8x64xf32>
    %32 = arith.mulf %31, %6 : vector<8x64xf32>
    %cst_30 = arith.constant 5.000000e-01 : f32
    %33 = vector.broadcast %cst_30 : f32 to vector<8x64xf32>
    %34 = arith.mulf %33, %9 : vector<8x64xf32>
    %35 = arith.addf %32, %34 : vector<8x64xf32>
    %cst_31 = arith.constant 2.500000e-01 : f32
    %36 = vector.broadcast %cst_31 : f32 to vector<8x64xf32>
    %37 = arith.mulf %36, %12 : vector<8x64xf32>
    %38 = arith.addf %35, %37 : vector<8x64xf32>
    %c0_32 = arith.constant 0 : index
    %c64 = arith.constant 64 : index
    %39 = vector.load %arg3[%c0_32, %c64] : memref<8x256xf32, #tpu.memory_space<vmem>>, vector<8x64xf32>
    tpu.vector_store %arg3[%c0_32, %c64], %38 {strides = array<i32>} : memref<8x256xf32, #tpu.memory_space<vmem>>, vector<8x64xf32>,
    %cst_33 = arith.constant 2.500000e-01 : f32
    %40 = vector.broadcast %cst_33 : f32 to vector<8x64xf32>
    %41 = arith.mulf %40, %12 : vector<8x64xf32>
    %cst_34 = arith.constant 5.000000e-01 : f32
    %42 = vector.broadcast %cst_34 : f32 to vector<8x64xf32>
    %43 = arith.mulf %42, %15 : vector<8x64xf32>
    %44 = arith.addf %41, %43 : vector<8x64xf32>
    %cst_35 = arith.constant 2.500000e-01 : f32
    %45 = vector.broadcast %cst_35 : f32 to vector<8x64xf32>
    %46 = arith.mulf %45, %18 : vector<8x64xf32>
    %47 = arith.addf %44, %46 : vector<8x64xf32>
    %c0_36 = arith.constant 0 : index
    %c128 = arith.constant 128 : index
    %48 = vector.load %arg3[%c0_36, %c128] : memref<8x256xf32, #tpu.memory_space<vmem>>, vector<8x64xf32>
    tpu.vector_store %arg3[%c0_36, %c128], %47 {strides = array<i32>} : memref<8x256xf32, #tpu.memory_space<vmem>>, vector<8x64xf32>,
    %cst_37 = arith.constant 2.500000e-01 : f32
    %49 = vector.broadcast %cst_37 : f32 to vector<8x64xf32>
    %50 = arith.mulf %49, %18 : vector<8x64xf32>
    %cst_38 = arith.constant 5.000000e-01 : f32
    %51 = vector.broadcast %cst_38 : f32 to vector<8x64xf32>
    %52 = arith.mulf %51, %21 : vector<8x64xf32>
    %53 = arith.addf %50, %52 : vector<8x64xf32>
    %cst_39 = arith.constant 2.500000e-01 : f32
    %54 = vector.broadcast %cst_39 : f32 to vector<8x64xf32>
    %55 = arith.mulf %54, %24 : vector<8x64xf32>
    %56 = arith.addf %53, %55 : vector<8x64xf32>
    %c0_40 = arith.constant 0 : index
    %c192 = arith.constant 192 : index
    %57 = vector.load %arg3[%c0_40, %c192] : memref<8x256xf32, #tpu.memory_space<vmem>>, vector<8x64xf32>
    tpu.vector_store %arg3[%c0_40, %c192], %56 {strides = array<i32>} : memref<8x256xf32, #tpu.memory_space<vmem>>, vector<8x64xf32>,
    return
  }
  func.func @transform_0(%arg0: i32) -> (i32, i32) {
    %c0_i32 = arith.constant 0 : i32
    %c0_i32_0 = arith.constant 0 : i32
    %c0_i32_1 = arith.constant 0 : i32
    return %c0_i32, %c0_i32_0 : i32, i32
  }
  func.func @transform_1(%arg0: i32) -> (i32, i32, i32) {
    %c0_i32 = arith.constant 0 : i32
    %c0_i32_0 = arith.constant 0 : i32
    %c0_i32_1 = arith.constant 0 : i32
    return %arg0, %c0_i32, %c0_i32_0 : i32, i32, i32
  }
  func.func @transform_2(%arg0: i32) -> (i32, i32) {
    %c0_i32 = arith.constant 0 : i32
    %c0_i32_0 = arith.constant 0 : i32
    return %arg0, %c0_i32 : i32, i32
  }
}

</mosaic_0001>

<bundles_post_ra>
// kernel: tpu_custom_call.1
= control target key start
LH: loop header
LB: loop body
LE: loop exit
PB: predicated region body
PF: predicated region fallthrough
CT: control target
= control target key end

     0   :  { %s1485_s0 = inlined_call_operand.vmem [shape: f32[256,64], index: 0, kind: input, shape index: {}]   ;;  %s1486_s1 = inlined_call_operand.vmem [shape: f32[8,8,256], index: 1, kind: input, shape index: {}]   ;;  %s1487_s2 = inlined_call_operand.hbm [shape: f32[8,256], index: 2, kind: output, shape index: {}]  }
   0x1   :  { %v863_v0 = vld [vmem:[%s1485_s0 + $0x78] sm:$0xff]  ;;  %v873_v2 = vld [vmem:[%s1485_s0 + $0x70] sm:$0xff]  ;;  %v887_v4 = vld [vmem:[%s1485_s0 + $0x68] sm:$0xff] }
   0x2   :  { %v868_v1 = vld [vmem:[%s1485_s0 + $0xf8] sm:$0xff]  ;;  %86 = vmatpush.msra.mxu0 %v863_v0  ;;  %v880_v3 = vld [vmem:[%s1485_s0 + $0xf0] sm:$0xff]  ;;  %169 = vmatpush.msra.mxu2 %v863_v0  ;;  %v892_v5 = vld [vmem:[%s1485_s0 + $0xe8] sm:$0xff] }
   0x3   :  { %106 = vmatpush.msra.mxu1 %v868_v1  ;;  %189 = vmatpush.msra.mxu3 %v868_v1  ;;  %v901_v6 = vld [vmem:[%s1485_s0 + $0x60] sm:$0xff]  ;;  %v915_v8 = vld [vmem:[%s1485_s0 + $0x58] sm:$0xff]  ;;  %v929_v10 = vld [vmem:[%s1485_s0 + $0x50] sm:$0xff] }
   0x4   :  { %87 = vmatpush.msra.mxu0 %v873_v2  ;;  %170 = vmatpush.msra.mxu2 %v873_v2  ;;  %v906_v7 = vld [vmem:[%s1485_s0 + $0xe0] sm:$0xff]  ;;  %v920_v9 = vld [vmem:[%s1485_s0 + $0xd8] sm:$0xff]  ;;  %v934_v11 = vld [vmem:[%s1485_s0 + $0xd0] sm:$0xff] }
   0x5   :  { %107 = vmatpush.msra.mxu1 %v880_v3  ;;  %190 = vmatpush.msra.mxu3 %v880_v3  ;;  %v943_v12 = vld [vmem:[%s1485_s0 + $0x48] sm:$0xff]  ;;  %v960_v15 = vld [vmem:[%s1485_s0 + $0x40] sm:$0xff]  ;;  %v752_v17 = vld [vmem:[%s1486_s1 + $0x10] ss:$8 sm:$0x3] }
   0x6   :  { %88 = vmatpush.msra.mxu0 %v887_v4  ;;  %171 = vmatpush.msra.mxu2 %v887_v4  ;;  %v948_v13 = vld [vmem:[%s1485_s0 + $0xc8] sm:$0xff]  ;;  %v965_v16 = vld [vmem:[%s1485_s0 + $0xc0] sm:$0xff]  ;;  %v975_v18 = vld [vmem:[%s1485_s0 + $0x38] sm:$0xff]  ;;  %69 = vst [vmem:[#allocation1 + $0x1] ss:$9 sm:$0xff] %v752_v17 }
   0x7   :  { %108 = vmatpush.msra.mxu1 %v892_v5  ;;  %191 = vmatpush.msra.mxu3 %v892_v5  ;;  %v44_v14 = vld [vmem:[%s1486_s1] ss:$8 sm:$0x3]  ;;  %v985_v20 = vld [vmem:[%s1485_s0 + $0xb8] sm:$0xff]  ;;  %v995_v22 = vld [vmem:[%s1485_s0 + $0x30] sm:$0xff] }
   0x8   :  { %89 = vmatpush.msra.mxu0 %v901_v6  ;;  %172 = vmatpush.msra.mxu2 %v901_v6  ;;  %v753_v19 = vld [vmem:[%s1486_s1 + $0x20] ss:$8 sm:$0x3]  ;;  %v754_v21 = vld [vmem:[%s1486_s1 + $0x30] ss:$8 sm:$0x3] }
   0x9   :  { %109 = vmatpush.msra.mxu1 %v906_v7  ;;  %192 = vmatpush.msra.mxu3 %v906_v7  ;;  %67 = vst [vmem:[#allocation1] ss:$9 sm:$0xff] %v44_v14  ;;  %v755_v23 = vld [vmem:[%s1486_s1 + $0x40] ss:$8 sm:$0x3]  ;;  %v1005_v24 = vld [vmem:[%s1485_s0 + $0xb0] sm:$0xff] }
   0xa   :  { %90 = vmatpush.msra.mxu0 %v915_v8  ;;  %173 = vmatpush.msra.mxu2 %v915_v8  ;;  %v756_v25 = vld [vmem:[%s1486_s1 + $0x50] ss:$8 sm:$0x3]  ;;  %71 = vst [vmem:[#allocation1 + $0x2] ss:$9 sm:$0xff] %v753_v19  ;;  %v1015_v26 = vld [vmem:[%s1485_s0 + $0x28] sm:$0xff] }
   0xb   :  { %110 = vmatpush.msra.mxu1 %v920_v9  ;;  %193 = vmatpush.msra.mxu3 %v920_v9  ;;  %v757_v27 = vld [vmem:[%s1486_s1 + $0x60] ss:$8 sm:$0x3]  ;;  %73 = vst [vmem:[#allocation1 + $0x3] ss:$9 sm:$0xff] %v754_v21  ;;  %v1051_v32 = vld [vmem:[%s1485_s0 + $0x18] sm:$0xff] }
   0xc   :  { %91 = vmatpush.msra.mxu0 %v929_v10  ;;  %174 = vmatpush.msra.mxu2 %v929_v10  ;;  %v1025_v28 = vld [vmem:[%s1485_s0 + $0xa8] sm:$0xff]  ;;  %v758_v29 = vld [vmem:[%s1486_s1 + $0x70] ss:$8 sm:$0x3]  ;;  %75 = vst [vmem:[#allocation1 + $0x4] ss:$9 sm:$0xff] %v755_v23 }
   0xd   :  { %111 = vmatpush.msra.mxu1 %v934_v11  ;;  %194 = vmatpush.msra.mxu3 %v934_v11  ;;  %77 = vst [vmem:[#allocation1 + $0x5] ss:$9 sm:$0xff] %v756_v25  ;;  %v1037_v30 = vld [vmem:[%s1485_s0 + $0x20] sm:$0xff]  ;;  %v1056_v33 = vld [vmem:[%s1485_s0 + $0x98] sm:$0xff]  ;;  %v1065_v34 = vld [vmem:[%s1485_s0 + $0x10] sm:$0xff] }
   0xe   :  { %92 = vmatpush.msra.mxu0 %v943_v12  ;;  %175 = vmatpush.msra.mxu2 %v943_v12  ;;  %v1042_v31 = vld [vmem:[%s1485_s0 + $0xa0] sm:$0xff]  ;;  %79 = vst [vmem:[#allocation1 + $0x6] ss:$9 sm:$0xff] %v757_v27  ;;  %v1070_v35 = vld [vmem:[%s1485_s0 + $0x90] sm:$0xff]  ;;  %v1077_v36 = vld [vmem:[%s1485_s0 + $0x8] sm:$0xff] }
   0xf   :  { %112 = vmatpush.msra.mxu1 %v948_v13  ;;  %195 = vmatpush.msra.mxu3 %v948_v13  ;;  %81 = vst [vmem:[#allocation1 + $0x7] ss:$9 sm:$0xff] %v758_v29  ;;  %v1084_v37 = vld [vmem:[%s1485_s0 + $0x88] sm:$0xff] }
  0x10   :  { %93 = vmatpush.msra.mxu0 %v960_v15  ;;  %176 = vmatpush.msra.mxu2 %v960_v15  ;;  %v759_v38 = vld [vmem:[%s1486_s1 + $0x1] ss:$8 sm:$0x3] }
  0x11   :  { %113 = vmatpush.msra.mxu1 %v965_v16  ;;  %196 = vmatpush.msra.mxu3 %v965_v16 }
  0x12   :  { %94 = vmatpush.msra.mxu0 %v975_v18  ;;  %177 = vmatpush.msra.mxu2 %v975_v18 }
  0x13   :  { %114 = vmatpush.msra.mxu1 %v985_v20  ;;  %197 = vmatpush.msra.mxu3 %v985_v20 }
  0x14   :  { %95 = vmatpush.msra.mxu0 %v995_v22  ;;  %178 = vmatpush.msra.mxu2 %v995_v22 }
  0x15   :  { %115 = vmatpush.msra.mxu1 %v1005_v24  ;;  %198 = vmatpush.msra.mxu3 %v1005_v24 }
  0x16   :  { %96 = vmatpush.msra.mxu0 %v1015_v26  ;;  %179 = vmatpush.msra.mxu2 %v1015_v26 }
  0x17   :  { %116 = vmatpush.msra.mxu1 %v1025_v28  ;;  %199 = vmatpush.msra.mxu3 %v1025_v28 }
  0x18   :  { %97 = vmatpush.msra.mxu0 %v1037_v30  ;;  %180 = vmatpush.msra.mxu2 %v1037_v30 }
  0x19   :  { %117 = vmatpush.msra.mxu1 %v1042_v31  ;;  %200 = vmatpush.msra.mxu3 %v1042_v31 }
  0x1a   :  { %98 = vmatpush.msra.mxu0 %v1051_v32  ;;  %181 = vmatpush.msra.mxu2 %v1051_v32 }
  0x1b   :  { %118 = vmatpush.msra.mxu1 %v1056_v33  ;;  %201 = vmatpush.msra.mxu3 %v1056_v33 }
  0x1c   :  { %7 = vsyncpa [#allocation3], 0  ;;  %99 = vmatpush.msra.mxu0 %v1065_v34  ;;  %v1094_v39 = vld [vmem:[%s1485_s0] sm:$0xff]  ;;  %v760_v41 = vld [vmem:[%s1486_s1 + $0x11] ss:$8 sm:$0x3]  ;;  %182 = vmatpush.msra.mxu2 %v1065_v34 }
  0x1d   :  { %119 = vmatpush.msra.mxu1 %v1070_v35  ;;  %v1099_v40 = vld [vmem:[%s1485_s0 + $0x80] sm:$0xff]  ;;  %202 = vmatpush.msra.mxu3 %v1070_v35  ;;  %v1108_v43 = vld [vmem:[#allocation1 + $0x9] sm:$0xff]  ;;  %v762_v45 = vld [vmem:[%s1486_s1 + $0x31] ss:$8 sm:$0x3]  ;;  %vm710_vm0 = vcmask 523264  }
  0x1e   :  { %v1106_v42 = vld [vmem:[#allocation1] sm:$0xff]  ;;  %100 = vmatpush.msra.mxu0 %v1077_v36  ;;  %183 = vmatpush.msra.mxu2 %v1077_v36  ;;  %v764_v47 = vld [vmem:[%s1486_s1 + $0x51] ss:$8 sm:$0x3]  ;;  %vm720_vm1 = vcmask 1048064   ;;  %s844_s29 = smov [#allocation2]  }
  0x1f   :  { %v761_v44 = vld [vmem:[%s1486_s1 + $0x21] ss:$8 sm:$0x3]  ;;  %120 = vmatpush.msra.mxu1 %v1084_v37  ;;  %150 = vst [vmem:[#allocation1] ss:$9 sm:$0xff] %v759_v38  ;;  %203 = vmatpush.msra.mxu3 %v1084_v37  ;;  %s741_s30 = sshll.u32 %s844_s29, 4  ;;  %s742_s30 = int_to_ptr.vmem [resolvable:$true] %s741_s30 }
  0x20   :  { %v763_v46 = vld [vmem:[%s1486_s1 + $0x41] ss:$8 sm:$0x3]  ;;  %152 = vst [vmem:[#allocation1 + $0x1] ss:$9 sm:$0xff] %v760_v41  ;;  %101 = vmatpush.msra.mxu0 %v1094_v39  ;;  %184 = vmatpush.msra.mxu2 %v1094_v39  ;;  %s743_s5 = sshll.u32 %s1487_s2, 4  ;;  %s744_s5 = int_to_ptr.hbm [resolvable:$true] %s743_s5 }
  0x21   :  { %121 = vmatpush.msra.mxu1 %v1099_v40  ;;  %154 = vst [vmem:[#allocation1 + $0x2] ss:$9 sm:$0xff] %v761_v44  ;;  %204 = vmatpush.msra.mxu3 %v1099_v40  ;;  %v765_v48 = vld [vmem:[%s1486_s1 + $0x61] ss:$8 sm:$0x3] }
  0x22   :  { %156 = vst [vmem:[#allocation1 + $0x3] ss:$9 sm:$0xff] %v762_v45  ;;  %252 = vmatpush.msrb.mxu0 %v863_v0  ;;  %v766_v49 = vld [vmem:[%s1486_s1 + $0x71] ss:$8 sm:$0x3]  ;;  %335 = vmatpush.msrb.mxu2 %v863_v0 }
  0x23   :  { %272 = vmatpush.msrb.mxu1 %v868_v1  ;;  %158 = vst [vmem:[#allocation1 + $0x4] ss:$9 sm:$0xff] %v763_v46  ;;  %355 = vmatpush.msrb.mxu3 %v868_v1  ;;  %v767_v50 = vld [vmem:[%s1486_s1 + $0x2] ss:$8 sm:$0x3] }
  0x24   :  { %160 = vst [vmem:[#allocation1 + $0x5] ss:$9 sm:$0xff] %v764_v47  ;;  %253 = vmatpush.msrb.mxu0 %v873_v2  ;;  %336 = vmatpush.msrb.mxu2 %v873_v2  ;;  %v768_v51 = vld [vmem:[%s1486_s1 + $0x12] ss:$8 sm:$0x3] }
  0x25   :  { %273 = vmatpush.msrb.mxu1 %v880_v3  ;;  %162 = vst [vmem:[#allocation1 + $0x6] ss:$9 sm:$0xff] %v765_v48  ;;  %356 = vmatpush.msrb.mxu3 %v880_v3  ;;  %v769_v54 = vld [vmem:[%s1486_s1 + $0x22] ss:$8 sm:$0x3] }
  0x26   :  { %164 = vst [vmem:[#allocation1 + $0x7] ss:$9 sm:$0xff] %v766_v49  ;;  %254 = vmatpush.msrb.mxu0 %v887_v4  ;;  %337 = vmatpush.msrb.mxu2 %v887_v4  ;;  %v770_v55 = vld [vmem:[%s1486_s1 + $0x32] ss:$8 sm:$0x3] }
  0x27   :  { %274 = vmatpush.msrb.mxu1 %v892_v5  ;;  %357 = vmatpush.msrb.mxu3 %v892_v5  ;;  %v771_v56 = vld [vmem:[%s1486_s1 + $0x42] ss:$8 sm:$0x3]  ;;  %v772_v57 = vld [vmem:[%s1486_s1 + $0x52] ss:$8 sm:$0x3] }
  0x28   :  { %255 = vmatpush.msrb.mxu0 %v901_v6  ;;  %338 = vmatpush.msrb.mxu2 %v901_v6  ;;  %v773_v58 = vld [vmem:[%s1486_s1 + $0x62] ss:$8 sm:$0x3]  ;;  %v774_v59 = vld [vmem:[%s1486_s1 + $0x72] ss:$8 sm:$0x3] }
  0x29   :  { %275 = vmatpush.msrb.mxu1 %v906_v7  ;;  %358 = vmatpush.msrb.mxu3 %v906_v7  ;;  %v775_v60 = vld [vmem:[%s1486_s1 + $0x3] ss:$8 sm:$0x3]  ;;  %v776_v61 = vld [vmem:[%s1486_s1 + $0x13] ss:$8 sm:$0x3] }
  0x2a   :  { %256 = vmatpush.msrb.mxu0 %v915_v8  ;;  %339 = vmatpush.msrb.mxu2 %v915_v8  ;;  %v777_v14 = vld [vmem:[%s1486_s1 + $0x23] ss:$8 sm:$0x3]  ;;  %v778_v17 = vld [vmem:[%s1486_s1 + $0x33] ss:$8 sm:$0x3] }
  0x2b   :  { %276 = vmatpush.msrb.mxu1 %v920_v9  ;;  %359 = vmatpush.msrb.mxu3 %v920_v9  ;;  %v779_v19 = vld [vmem:[%s1486_s1 + $0x43] ss:$8 sm:$0x3]  ;;  %v780_v21 = vld [vmem:[%s1486_s1 + $0x53] ss:$8 sm:$0x3] }
  0x2c   :  { %257 = vmatpush.msrb.mxu0 %v929_v10  ;;  %340 = vmatpush.msrb.mxu2 %v929_v10  ;;  %v781_v23 = vld [vmem:[%s1486_s1 + $0x63] ss:$8 sm:$0x3]  ;;  %v782_v25 = vld [vmem:[%s1486_s1 + $0x73] ss:$8 sm:$0x3] }
  0x2d   :  { %277 = vmatpush.msrb.mxu1 %v934_v11  ;;  %v165_v52 = vld [vmem:[#allocation1] sm:$0xff]  ;;  %v166_v53 = vld [vmem:[#allocation1 + $0x9] sm:$0xff]  ;;  %360 = vmatpush.msrb.mxu3 %v934_v11  ;;  %v784_v29 = vld [vmem:[%s1486_s1 + $0x14] ss:$8 sm:$0x3] }
  0x2e   :  { %233 = vst [vmem:[#allocation1] ss:$9 sm:$0xff] %v767_v50  ;;  %258 = vmatpush.msrb.mxu0 %v943_v12  ;;  %341 = vmatpush.msrb.mxu2 %v943_v12  ;;  %v783_v27 = vld [vmem:[%s1486_s1 + $0x4] ss:$8 sm:$0x3] }
  0x2f   :  { %278 = vmatpush.msrb.mxu1 %v948_v13  ;;  %235 = vst [vmem:[#allocation1 + $0x1] ss:$9 sm:$0xff] %v768_v51  ;;  %361 = vmatpush.msrb.mxu3 %v948_v13  ;;  %v787_v44 = vld [vmem:[%s1486_s1 + $0x44] ss:$8 sm:$0x3] }
  0x30   :  { %237 = vst [vmem:[#allocation1 + $0x2] ss:$9 sm:$0xff] %v769_v54  ;;  %259 = vmatpush.msrb.mxu0 %v960_v15  ;;  %342 = vmatpush.msrb.mxu2 %v960_v15  ;;  %v788_v45 = vld [vmem:[%s1486_s1 + $0x54] ss:$8 sm:$0x3] }
  0x31   :  { %279 = vmatpush.msrb.mxu1 %v965_v16  ;;  %239 = vst [vmem:[#allocation1 + $0x3] ss:$9 sm:$0xff] %v770_v55  ;;  %362 = vmatpush.msrb.mxu3 %v965_v16  ;;  %v789_v46 = vld [vmem:[%s1486_s1 + $0x64] ss:$8 sm:$0x3] }
  0x32   :  { %241 = vst [vmem:[#allocation1 + $0x4] ss:$9 sm:$0xff] %v771_v56  ;;  %260 = vmatpush.msrb.mxu0 %v975_v18  ;;  %343 = vmatpush.msrb.mxu2 %v975_v18  ;;  %v790_v47 = vld [vmem:[%s1486_s1 + $0x74] ss:$8 sm:$0x3] }
  0x33   :  { %280 = vmatpush.msrb.mxu1 %v985_v20  ;;  %243 = vst [vmem:[#allocation1 + $0x5] ss:$9 sm:$0xff] %v772_v57  ;;  %363 = vmatpush.msrb.mxu3 %v985_v20  ;;  %v791_v48 = vld [vmem:[%s1486_s1 + $0x5] ss:$8 sm:$0x3] }
  0x34   :  { %245 = vst [vmem:[#allocation1 + $0x6] ss:$9 sm:$0xff] %v773_v58  ;;  %261 = vmatpush.msrb.mxu0 %v995_v22  ;;  %344 = vmatpush.msrb.mxu2 %v995_v22  ;;  %v792_v49 = vld [vmem:[%s1486_s1 + $0x15] ss:$8 sm:$0x3] }
  0x35   :  { %281 = vmatpush.msrb.mxu1 %v1005_v24  ;;  %247 = vst [vmem:[#allocation1 + $0x7] ss:$9 sm:$0xff] %v774_v59  ;;  %364 = vmatpush.msrb.mxu3 %v1005_v24  ;;  %v795_v54 = vld [vmem:[%s1486_s1 + $0x45] ss:$8 sm:$0x3] }
  0x36   :  { %262 = vmatpush.msrb.mxu0 %v1015_v26  ;;  %345 = vmatpush.msrb.mxu2 %v1015_v26  ;;  %v796_v55 = vld [vmem:[%s1486_s1 + $0x55] ss:$8 sm:$0x3]  ;;  %v797_v56 = vld [vmem:[%s1486_s1 + $0x65] ss:$8 sm:$0x3] }
  0x37   :  { %282 = vmatpush.msrb.mxu1 %v1025_v28  ;;  %365 = vmatpush.msrb.mxu3 %v1025_v28  ;;  %v798_v57 = vld [vmem:[%s1486_s1 + $0x75] ss:$8 sm:$0x3]  ;;  %v799_v58 = vld [vmem:[%s1486_s1 + $0x6] ss:$8 sm:$0x3] }
  0x38   :  { %263 = vmatpush.msrb.mxu0 %v1037_v30  ;;  %346 = vmatpush.msrb.mxu2 %v1037_v30  ;;  %v800_v59 = vld [vmem:[%s1486_s1 + $0x16] ss:$8 sm:$0x3] }
  0x39   :  { %283 = vmatpush.msrb.mxu1 %v1042_v31  ;;  %366 = vmatpush.msrb.mxu3 %v1042_v31 }
  0x3a   :  { %264 = vmatpush.msrb.mxu0 %v1051_v32  ;;  %347 = vmatpush.msrb.mxu2 %v1051_v32 }
  0x3b   :  { %284 = vmatpush.msrb.mxu1 %v1056_v33  ;;  %367 = vmatpush.msrb.mxu3 %v1056_v33 }
  0x3c   :  { %v248_v62 = vld [vmem:[#allocation1] sm:$0xff]  ;;  %v249_v63 = vld [vmem:[#allocation1 + $0x9] sm:$0xff]  ;;  %185 = vmatmul.f32.vlgmr.msra.gmra.mxu2 %v165_v52  ;;  %205 = vmatmul.f32.vlgmr.msra.gmra.mxu3 %v166_v53  ;;  %v794_v53 = vld [vmem:[%s1486_s1 + $0x35] ss:$8 sm:$0x3] }
  0x3d   :  { %316 = vst [vmem:[#allocation1] ss:$9 sm:$0xff] %v775_v60  ;;  %265 = vmatpush.msrb.mxu0 %v1065_v34  ;;  %285 = vmatpush.msrb.mxu1 %v1070_v35  ;;  %v793_v52 = vld [vmem:[%s1486_s1 + $0x25] ss:$8 sm:$0x3] }
  0x3e   :  { %318 = vst [vmem:[#allocation1 + $0x1] ss:$9 sm:$0xff] %v776_v61  ;;  %348 = vmatpush.msrb.mxu2 %v1065_v34  ;;  %368 = vmatpush.msrb.mxu3 %v1070_v35 }
  0x3f   :  { %320 = vst [vmem:[#allocation1 + $0x2] ss:$9 sm:$0xff] %v777_v14  ;;  %266 = vmatpush.msrb.mxu0 %v1077_v36  ;;  %286 = vmatpush.msrb.mxu1 %v1084_v37 }
  0x40   :  { %322 = vst [vmem:[#allocation1 + $0x3] ss:$9 sm:$0xff] %v778_v17  ;;  %349 = vmatpush.msrb.mxu2 %v1077_v36  ;;  %369 = vmatpush.msrb.mxu3 %v1084_v37 }
  0x41   :  { %324 = vst [vmem:[#allocation1 + $0x4] ss:$9 sm:$0xff] %v779_v19  ;;  %102 = vmatmul.f32.vlgmr.msra.gmra.mxu0 %v1106_v42  ;;  %122 = vmatmul.f32.vlgmr.msra.gmra.mxu1 %v1108_v43  ;;  %v785_v42 = vld [vmem:[%s1486_s1 + $0x24] ss:$8 sm:$0x3] }
  0x42   :  { %326 = vst [vmem:[#allocation1 + $0x5] ss:$9 sm:$0xff] %v780_v21  ;;  %267 = vmatpush.msrb.mxu0 %v1094_v39  ;;  %287 = vmatpush.msrb.mxu1 %v1099_v40  ;;  %v786_v43 = vld [vmem:[%s1486_s1 + $0x34] ss:$8 sm:$0x3] }
  0x43   :  { %328 = vst [vmem:[#allocation1 + $0x6] ss:$9 sm:$0xff] %v781_v23  ;;  %350 = vmatpush.msrb.mxu2 %v1094_v39  ;;  %370 = vmatpush.msrb.mxu3 %v1099_v40 }
  0x44   :  { %330 = vst [vmem:[#allocation1 + $0x7] ss:$9 sm:$0xff] %v782_v25  ;;  %418 = vmatpush.msra.mxu0 %v863_v0  ;;  %438 = vmatpush.msra.mxu1 %v868_v1 }
  0x45   :  { %501 = vmatpush.msra.mxu2 %v863_v0  ;;  %521 = vmatpush.msra.mxu3 %v868_v1 }
  0x46   :  { %419 = vmatpush.msra.mxu0 %v873_v2  ;;  %439 = vmatpush.msra.mxu1 %v880_v3 }
  0x47   :  { %502 = vmatpush.msra.mxu2 %v873_v2  ;;  %522 = vmatpush.msra.mxu3 %v880_v3 }
  0x48   :  { %420 = vmatpush.msra.mxu0 %v887_v4  ;;  %440 = vmatpush.msra.mxu1 %v892_v5 }
  0x49   :  { %503 = vmatpush.msra.mxu2 %v887_v4  ;;  %523 = vmatpush.msra.mxu3 %v892_v5 }
  0x4a   :  { %268 = vmatmul.f32.vlgmr.msrb.gmra.mxu0 %v248_v62  ;;  %288 = vmatmul.f32.vlgmr.msrb.gmra.mxu1 %v249_v63  ;;  %v801_v62 = vld [vmem:[%s1486_s1 + $0x26] ss:$8 sm:$0x3]  ;;  %v804_v63 = vld [vmem:[%s1486_s1 + $0x56] ss:$8 sm:$0x3] }
  0x4b   :  { %v331_v38 = vld [vmem:[#allocation1] sm:$0xff]  ;;  %v332_v41 = vld [vmem:[#allocation1 + $0x9] sm:$0xff]  ;;  %421 = vmatpush.msra.mxu0 %v901_v6  ;;  %441 = vmatpush.msra.mxu1 %v906_v7 }
  0x4c   :  { %351 = vmatmul.f32.vlgmr.msrb.gmra.mxu2 %v331_v38  ;;  %371 = vmatmul.f32.vlgmr.msrb.gmra.mxu3 %v332_v41  ;;  %399 = vst [vmem:[#allocation1] ss:$9 sm:$0xff] %v783_v27 }
  0x4d   :  { %401 = vst [vmem:[#allocation1 + $0x1] ss:$9 sm:$0xff] %v784_v29  ;;  %504 = vmatpush.msra.mxu2 %v901_v6  ;;  %524 = vmatpush.msra.mxu3 %v906_v7 }
  0x4e   :  { %403 = vst [vmem:[#allocation1 + $0x2] ss:$9 sm:$0xff] %v785_v42  ;;  %422 = vmatpush.msra.mxu0 %v915_v8  ;;  %442 = vmatpush.msra.mxu1 %v920_v9 }
  0x4f   :  { %405 = vst [vmem:[#allocation1 + $0x3] ss:$9 sm:$0xff] %v786_v43  ;;  %505 = vmatpush.msra.mxu2 %v915_v8  ;;  %525 = vmatpush.msra.mxu3 %v920_v9 }
  0x50   :  { %407 = vst [vmem:[#allocation1 + $0x4] ss:$9 sm:$0xff] %v787_v44  ;;  %423 = vmatpush.msra.mxu0 %v929_v10  ;;  %443 = vmatpush.msra.mxu1 %v934_v11 }
  0x51   :  { %409 = vst [vmem:[#allocation1 + $0x5] ss:$9 sm:$0xff] %v788_v45  ;;  %506 = vmatpush.msra.mxu2 %v929_v10  ;;  %526 = vmatpush.msra.mxu3 %v934_v11 }
  0x52   :  { %411 = vst [vmem:[#allocation1 + $0x6] ss:$9 sm:$0xff] %v789_v46  ;;  %424 = vmatpush.msra.mxu0 %v943_v12  ;;  %444 = vmatpush.msra.mxu1 %v948_v13 }
  0x53   :  { %413 = vst [vmem:[#allocation1 + $0x7] ss:$9 sm:$0xff] %v790_v47  ;;  %507 = vmatpush.msra.mxu2 %v943_v12  ;;  %527 = vmatpush.msra.mxu3 %v948_v13 }
  0x54   :  { %425 = vmatpush.msra.mxu0 %v960_v15  ;;  %445 = vmatpush.msra.mxu1 %v965_v16 }
  0x55   :  { %508 = vmatpush.msra.mxu2 %v960_v15  ;;  %528 = vmatpush.msra.mxu3 %v965_v16 }
  0x56   :  { %426 = vmatpush.msra.mxu0 %v975_v18  ;;  %446 = vmatpush.msra.mxu1 %v985_v20 }
  0x57   :  { %509 = vmatpush.msra.mxu2 %v975_v18  ;;  %529 = vmatpush.msra.mxu3 %v985_v20 }
  0x58   :  { %427 = vmatpush.msra.mxu0 %v995_v22  ;;  %447 = vmatpush.msra.mxu1 %v1005_v24 }
  0x59   :  { %510 = vmatpush.msra.mxu2 %v995_v22  ;;  %530 = vmatpush.msra.mxu3 %v1005_v24 }
  0x5a   :  { %v1320_v50 = vld [vmem:[#allocation1] sm:$0xff]  ;;  %v1322_v51 = vld [vmem:[#allocation1 + $0x9] sm:$0xff]  ;;  %428 = vmatpush.msra.mxu0 %v1015_v26  ;;  %448 = vmatpush.msra.mxu1 %v1025_v28 }
  0x5b   :  { %482 = vst [vmem:[#allocation1] ss:$9 sm:$0xff] %v791_v48  ;;  %511 = vmatpush.msra.mxu2 %v1015_v26  ;;  %531 = vmatpush.msra.mxu3 %v1025_v28 }
  0x5c   :  { %484 = vst [vmem:[#allocation1 + $0x1] ss:$9 sm:$0xff] %v792_v49  ;;  %429 = vmatpush.msra.mxu0 %v1037_v30  ;;  %449 = vmatpush.msra.mxu1 %v1042_v31 }
  0x5d   :  { %486 = vst [vmem:[#allocation1 + $0x2] ss:$9 sm:$0xff] %v793_v52  ;;  %512 = vmatpush.msra.mxu2 %v1037_v30  ;;  %532 = vmatpush.msra.mxu3 %v1042_v31 }
  0x5e   :  { %488 = vst [vmem:[#allocation1 + $0x3] ss:$9 sm:$0xff] %v794_v53  ;;  %430 = vmatpush.msra.mxu0 %v1051_v32  ;;  %450 = vmatpush.msra.mxu1 %v1056_v33 }
  0x5f   :  { %490 = vst [vmem:[#allocation1 + $0x4] ss:$9 sm:$0xff] %v795_v54  ;;  %513 = vmatpush.msra.mxu2 %v1051_v32  ;;  %533 = vmatpush.msra.mxu3 %v1056_v33 }
  0x60   :  { %492 = vst [vmem:[#allocation1 + $0x5] ss:$9 sm:$0xff] %v796_v55  ;;  %431 = vmatpush.msra.mxu0 %v1065_v34  ;;  %451 = vmatpush.msra.mxu1 %v1070_v35 }
  0x61   :  { %494 = vst [vmem:[#allocation1 + $0x6] ss:$9 sm:$0xff] %v797_v56  ;;  %514 = vmatpush.msra.mxu2 %v1065_v34  ;;  %534 = vmatpush.msra.mxu3 %v1070_v35 }
  0x62   :  { %496 = vst [vmem:[#allocation1 + $0x7] ss:$9 sm:$0xff] %v798_v57  ;;  %432 = vmatpush.msra.mxu0 %v1077_v36  ;;  %452 = vmatpush.msra.mxu1 %v1084_v37 }
  0x63   :  { %515 = vmatpush.msra.mxu2 %v1077_v36  ;;  %535 = vmatpush.msra.mxu3 %v1084_v37 }
  0x64   :  { %433 = vmatpush.msra.mxu0 %v1094_v39  ;;  %453 = vmatpush.msra.mxu1 %v1099_v40 }
  0x65   :  { %516 = vmatpush.msra.mxu2 %v1094_v39  ;;  %536 = vmatpush.msra.mxu3 %v1099_v40 }
  0x66   :  { %584 = vmatpush.msrb.mxu0 %v863_v0  ;;  %604 = vmatpush.msrb.mxu1 %v868_v1 }
  0x67   :  { %667 = vmatpush.msrb.mxu2 %v863_v0  ;;  %687 = vmatpush.msrb.mxu3 %v868_v1  ;;  %v802_v0 = vld [vmem:[%s1486_s1 + $0x36] ss:$8 sm:$0x3]  ;;  %v803_v1 = vld [vmem:[%s1486_s1 + $0x46] ss:$8 sm:$0x3] }
  0x68   :  { %585 = vmatpush.msrb.mxu0 %v873_v2  ;;  %605 = vmatpush.msrb.mxu1 %v880_v3 }
  0x69   :  { %v497_v60 = vld [vmem:[#allocation1] sm:$0xff]  ;;  %v498_v61 = vld [vmem:[#allocation1 + $0x9] sm:$0xff]  ;;  %668 = vmatpush.msrb.mxu2 %v873_v2  ;;  %688 = vmatpush.msrb.mxu3 %v880_v3  ;;  %v806_v3 = vld [vmem:[%s1486_s1 + $0x76] ss:$8 sm:$0x3] }
  0x6a   :  { %517 = vmatmul.f32.vlgmr.msra.gmra.mxu2 %v497_v60  ;;  %537 = vmatmul.f32.vlgmr.msra.gmra.mxu3 %v498_v61  ;;  %565 = vst [vmem:[#allocation1] ss:$9 sm:$0xff] %v799_v58  ;;  %v805_v2 = vld [vmem:[%s1486_s1 + $0x66] ss:$8 sm:$0x3] }
  0x6b   :  { %567 = vst [vmem:[#allocation1 + $0x1] ss:$9 sm:$0xff] %v800_v59  ;;  %586 = vmatpush.msrb.mxu0 %v887_v4  ;;  %606 = vmatpush.msrb.mxu1 %v892_v5 }
  0x6c   :  { %569 = vst [vmem:[#allocation1 + $0x2] ss:$9 sm:$0xff] %v801_v62  ;;  %669 = vmatpush.msrb.mxu2 %v887_v4  ;;  %689 = vmatpush.msrb.mxu3 %v892_v5  ;;  %v807_v4 = vld [vmem:[%s1486_s1 + $0x7] ss:$8 sm:$0x3] }
  0x6d   :  { %571 = vst [vmem:[#allocation1 + $0x3] ss:$9 sm:$0xff] %v802_v0  ;;  %434 = vmatmul.f32.vlgmr.msra.gmra.mxu0 %v1320_v50  ;;  %454 = vmatmul.f32.vlgmr.msra.gmra.mxu1 %v1322_v51  ;;  %v808_v5 = vld [vmem:[%s1486_s1 + $0x17] ss:$8 sm:$0x3] }
  0x6e   :  { %573 = vst [vmem:[#allocation1 + $0x4] ss:$9 sm:$0xff] %v803_v1  ;;  %587 = vmatpush.msrb.mxu0 %v901_v6  ;;  %607 = vmatpush.msrb.mxu1 %v906_v7 }
  0x6f   :  { %575 = vst [vmem:[#allocation1 + $0x5] ss:$9 sm:$0xff] %v804_v63  ;;  %670 = vmatpush.msrb.mxu2 %v901_v6  ;;  %690 = vmatpush.msrb.mxu3 %v906_v7 }
  0x70   :  { %577 = vst [vmem:[#allocation1 + $0x6] ss:$9 sm:$0xff] %v805_v2  ;;  %588 = vmatpush.msrb.mxu0 %v915_v8  ;;  %608 = vmatpush.msrb.mxu1 %v920_v9 }
  0x71   :  { %579 = vst [vmem:[#allocation1 + $0x7] ss:$9 sm:$0xff] %v806_v3  ;;  %671 = vmatpush.msrb.mxu2 %v915_v8  ;;  %691 = vmatpush.msrb.mxu3 %v920_v9  ;;  %v809_v8 = vld [vmem:[%s1486_s1 + $0x27] ss:$8 sm:$0x3] }
  0x72   :  { %589 = vmatpush.msrb.mxu0 %v929_v10  ;;  %609 = vmatpush.msrb.mxu1 %v934_v11  ;;  %v810_v9 = vld [vmem:[%s1486_s1 + $0x37] ss:$8 sm:$0x3] }
  0x73   :  { %672 = vmatpush.msrb.mxu2 %v929_v10  ;;  %692 = vmatpush.msrb.mxu3 %v934_v11  ;;  %v811_v10 = vld [vmem:[%s1486_s1 + $0x47] ss:$8 sm:$0x3]  ;;  %v812_v11 = vld [vmem:[%s1486_s1 + $0x57] ss:$8 sm:$0x3] }
  0x74   :  { %590 = vmatpush.msrb.mxu0 %v943_v12  ;;  %610 = vmatpush.msrb.mxu1 %v948_v13 }
  0x75   :  { %673 = vmatpush.msrb.mxu2 %v943_v12  ;;  %693 = vmatpush.msrb.mxu3 %v948_v13  ;;  %v813_v12 = vld [vmem:[%s1486_s1 + $0x67] ss:$8 sm:$0x3]  ;;  %v814_v13 = vld [vmem:[%s1486_s1 + $0x77] ss:$8 sm:$0x3] }
  0x76   :  { %591 = vmatpush.msrb.mxu0 %v960_v15  ;;  %611 = vmatpush.msrb.mxu1 %v965_v16  ;;  %s843_s1 = smov 64  }
  0x77   :  { %674 = vmatpush.msrb.mxu2 %v960_v15  ;;  %694 = vmatpush.msrb.mxu3 %v965_v16 }
  0x78   :  { %v580_v6 = vld [vmem:[#allocation1] sm:$0xff]  ;;  %v581_v7 = vld [vmem:[#allocation1 + $0x9] sm:$0xff]  ;;  %592 = vmatpush.msrb.mxu0 %v975_v18  ;;  %612 = vmatpush.msrb.mxu1 %v985_v20 }
  0x79   :  { %648 = vst [vmem:[#allocation1] ss:$9 sm:$0xff] %v807_v4  ;;  %675 = vmatpush.msrb.mxu2 %v975_v18  ;;  %695 = vmatpush.msrb.mxu3 %v985_v20 }
  0x7a   :  { %650 = vst [vmem:[#allocation1 + $0x1] ss:$9 sm:$0xff] %v808_v5  ;;  %593 = vmatpush.msrb.mxu0 %v995_v22  ;;  %613 = vmatpush.msrb.mxu1 %v1005_v24 }
  0x7b   :  { %652 = vst [vmem:[#allocation1 + $0x2] ss:$9 sm:$0xff] %v809_v8  ;;  %676 = vmatpush.msrb.mxu2 %v995_v22  ;;  %696 = vmatpush.msrb.mxu3 %v1005_v24 }
  0x7c   :  { %654 = vst [vmem:[#allocation1 + $0x3] ss:$9 sm:$0xff] %v810_v9  ;;  %594 = vmatpush.msrb.mxu0 %v1015_v26  ;;  %614 = vmatpush.msrb.mxu1 %v1025_v28 }
  0x7d   :  { %656 = vst [vmem:[#allocation1 + $0x4] ss:$9 sm:$0xff] %v811_v10  ;;  %677 = vmatpush.msrb.mxu2 %v1015_v26  ;;  %697 = vmatpush.msrb.mxu3 %v1025_v28 }
  0x7e   :  { %658 = vst [vmem:[#allocation1 + $0x5] ss:$9 sm:$0xff] %v812_v11  ;;  %595 = vmatpush.msrb.mxu0 %v1037_v30  ;;  %615 = vmatpush.msrb.mxu1 %v1042_v31 }
  0x7f   :  { %660 = vst [vmem:[#allocation1 + $0x6] ss:$9 sm:$0xff] %v813_v12  ;;  %678 = vmatpush.msrb.mxu2 %v1037_v30  ;;  %698 = vmatpush.msrb.mxu3 %v1042_v31 }
  0x80   :  { %662 = vst [vmem:[#allocation1 + $0x7] ss:$9 sm:$0xff] %v814_v13  ;;  %596 = vmatpush.msrb.mxu0 %v1051_v32  ;;  %616 = vmatpush.msrb.mxu1 %v1056_v33 }
  0x81   :  { %679 = vmatpush.msrb.mxu2 %v1051_v32  ;;  %699 = vmatpush.msrb.mxu3 %v1056_v33 }
  0x82   :  { %597 = vmatpush.msrb.mxu0 %v1065_v34  ;;  %617 = vmatpush.msrb.mxu1 %v1070_v35 }
  0x83   :  { %680 = vmatpush.msrb.mxu2 %v1065_v34  ;;  %700 = vmatpush.msrb.mxu3 %v1070_v35 }
  0x84   :  { %598 = vmatpush.msrb.mxu0 %v1077_v36  ;;  %618 = vmatpush.msrb.mxu1 %v1084_v37 }
  0x85   :  { %681 = vmatpush.msrb.mxu2 %v1077_v36  ;;  %701 = vmatpush.msrb.mxu3 %v1084_v37 }
  0x86   :  { %599 = vmatpush.msrb.mxu0 %v1094_v39  ;;  %619 = vmatpush.msrb.mxu1 %v1099_v40 }
  0x87   :  { %v663_v15 = vld [vmem:[#allocation1] sm:$0xff]  ;;  %v664_v16 = vld [vmem:[#allocation1 + $0x9] sm:$0xff]  ;;  %682 = vmatpush.msrb.mxu2 %v1094_v39  ;;  %702 = vmatpush.msrb.mxu3 %v1099_v40 }
  0x88   :  { %600 = vmatmul.f32.vlgmr.msrb.gmra.mxu0 %v580_v6  ;;  %620 = vmatmul.f32.vlgmr.msrb.gmra.mxu1 %v581_v7 }
  0x89   :  { %683 = vmatmul.f32.vlgmr.msrb.gmra.mxu2 %v663_v15  ;;  %703 = vmatmul.f32.vlgmr.msrb.gmra.mxu3 %v664_v16 }
  0xbe   :  { %v103_v18 = vpop.f32.mrf.mxu0  ;;  %v123_v20 = vpop.f32.mrf.mxu1 }
  0xbf   :  { %v124_v22 = vadd.f32 %v123_v20, %v103_v18  ;;  %v186_v24 = vpop.f32.mrf.mxu2  ;;  %v206_v26 = vpop.f32.mrf.mxu3 }
  0xc0   :  { %v207_v28 = vadd.f32 %v206_v26, %v186_v24 }
  0xc1   :  { %v707_v30 = vmul.f32 0.75, %v124_v22 }
  0xc2   :  { %v708_v31 = vmul.f32 0.25, %v207_v28 }
  0xc4   :  { %v709_v32 = vadd.f32 %v708_v31, %v707_v30 }
  0xc6   :  { %711 = vst.msk [vmem:[#allocation2] sm:$0xff] %vm710_vm0, %v709_v32 }
  0xc7   :  { %v269_v33 = vpop.f32.mrf.mxu0  ;;  %v289_v34 = vpop.f32.mrf.mxu1 }
  0xc8   :  { %v290_v35 = vadd.f32 %v289_v34, %v269_v33 }
  0xca   :  { %v712_v36 = vmul.f32 0.5, %v290_v35 }
  0xcc   :  { %v713_v40 = vadd.f32 %v712_v36, %v708_v31 }
  0xcf   :  { %v352_v37 = vpop.f32.mrf.mxu2  ;;  %v372_v39 = vpop.f32.mrf.mxu3 }
  0xd0   :  { %v373_v14 = vadd.f32 %v372_v39, %v352_v37 }
  0xd2   :  { %v714_v17 = vmul.f32 0.25, %v373_v14 }
  0xd4   :  { %v715_v19 = vadd.f32 %v714_v17, %v713_v40 }
  0xd6   :  { %717 = vrot.lane.b32.xlu0 %v715_v19, %s843_s1 }
  0xea   :  { %v435_v21 = vpop.f32.mrf.mxu0  ;;  %v455_v23 = vpop.f32.mrf.mxu1 }
  0xeb   :  { %v456_v25 = vadd.f32 %v455_v23, %v435_v21 }
  0xed   :  { %v518_v27 = vpop.f32.mrf.mxu2  ;;  %v538_v29 = vpop.f32.mrf.mxu3  ;;  %v722_v38 = vmul.f32 0.5, %v456_v25 }
  0xee   :  { %v539_v41 = vadd.f32 %v538_v29, %v518_v27 }
  0xef   :  { %v723_v42 = vadd.f32 %v722_v38, %v714_v17 }
  0xf0   :  { %v724_v43 = vmul.f32 0.25, %v539_v41 }
  0xf2   :  { %v725_v44 = vadd.f32 %v724_v43, %v723_v42 }
  0xf4   :  { %726 = vst.msk [vmem:[#allocation2 + $0x8] sm:$0xff] %vm710_vm0, %v725_v44 }
 0x105   :  { %v601_v45 = vpop.f32.mrf.mxu0  ;;  %v621_v46 = vpop.f32.mrf.mxu1 }
 0x106   :  { %v622_v47 = vadd.f32 %v621_v46, %v601_v45 }
 0x108   :  { %v727_v48 = vmul.f32 0.5, %v622_v47 }
 0x10a   :  { %v728_v52 = vadd.f32 %v727_v48, %v724_v43 }
 0x10c   :  { %v684_v49 = vpop.f32.mrf.mxu2  ;;  %v704_v50 = vpop.f32.mrf.mxu3 }
 0x10d   :  { %v705_v51 = vadd.f32 %v704_v50, %v684_v49 }
 0x10f   :  { %v729_v53 = vmul.f32 0.25, %v705_v51 }
 0x111   :  { %v730_v54 = vadd.f32 %v729_v53, %v728_v52 }
 0x113   :  { %732 = vrot.lane.b32.xlu0 %v730_v54, %s843_s1 }
 0x148   :  { %v718_v55 = vpop.permute.xlu0 %717 }
 0x149   :  { %721 = vst.msk [vmem:[#allocation2] sm:$0xff] %vm720_vm1, %v718_v55 }
 0x185   :  { %v733_v56 = vpop.permute.xlu0 %732 }
 0x186   :  { %735 = vst.msk [vmem:[#allocation2 + $0x8] sm:$0xff] %vm720_vm1, %v733_v56 }
 0x187   :  { %746 = dma.vmem_to_hbm [thread:$0]  %s742_s30, 256, %s744_s5, [#allocation3]  }
 0x188   :  { %841 = dma.done.wait [#allocation3], 256  }
 0x189   :  { %842 = vsyncadd [#allocation3], 4294967040 }
 0x18a   :  { %751 = vsyncpa [#allocation3], 1 }

</bundles_post_ra>
